<compile_context>
chip_gen: v7x
topology: tpu7x:2x2x1
jax: 0.10.0
libtpu: 0.0.40
codegen_flags: <defaults>
</compile_context>

<pallas_src>
import functools

import jax
import jax.numpy as jnp
from jax import lax
from jax.experimental import pallas as pl
from jax.experimental.pallas import tpu as pltpu

EPS = 1e-5


def _make_col_masks(H, W, C):
    """Masks over the (C, (H+2)*W) flat, vertically padded layout marking the
    first / last column of each spatial row (horizontal-reflection fix-ups)."""
    lanes = lax.broadcasted_iota(jnp.int32, (C, (H + 2) * W), 1)
    if W & (W - 1) == 0:               # power-of-two width: cheap bitwise AND
        col = lanes & (W - 1)
    else:                              # general case
        col = lax.rem(lanes, W)
    return col == 0, col == (W - 1)


def _conv3x3_reflect(x_bf, w, col_masks, H, W, C):
    """3x3 conv with reflect-pad-1 in channel-major spatially-flat layout.

    x_bf: (C, H*W) bf16 activations (cast once by the caller).
    w:    (C, 9*C) bf16 weights, k index = (dy*3 + dx)*C + cin.
    Returns (C, H*W) f32 via a single MXU matmul with K = 9*C.
    No bias: InstanceNorm(affine=False) cancels any per-channel constant.
    """
    first_col, last_col = col_masks
    HW = H * W

    # Vertical reflection pad: rows [x[1], x[0..H-1], x[H-2]] -> (C, (H+2)*W).
    vpad = jnp.concatenate(
        [x_bf[:, W:2 * W], x_bf, x_bf[:, (H - 2) * W:(H - 1) * W]], axis=-1)

    # Horizontal taps with reflection: lane rotations + boundary select.
    # roll(v, +1)[l] = v[l-1]; roll(v, -1)[l] = v[l+1]; the row-boundary wrap
    # positions are exactly the ones overridden by the select.
    rot_m1 = jnp.roll(vpad, 1, axis=-1)     # value of column w-1
    rot_p1 = jnp.roll(vpad, -1, axis=-1)    # value of column w+1
    left = jnp.where(first_col, rot_p1, rot_m1)   # dx = 0 (col w-1, reflected)
    center = vpad                                 # dx = 1 (col w)
    right = jnp.where(last_col, rot_m1, rot_p1)   # dx = 2 (col w+1, reflected)
    shifted = (left, center, right)

    # im2col^T: rows ordered k = (dy*3 + dx)*C + cin; dy windows are pure
    # lane slices of the flat shifted arrays (stride-W row layout).
    taps = [shifted[dx][:, dy * W:dy * W + HW]
            for dy in range(3) for dx in range(3)]
    im2col = jnp.concatenate(taps, axis=0)          # (9C, H*W) bf16

    return jnp.dot(w, im2col, preferred_element_type=jnp.float32)  # (C, H*W) f32


def _instance_norm(y, HW):
    """Single-pass instance norm (affine=False, eps=1e-5) over the lane axis
    (spatial positions) of a (C, H*W) f32 array: var = E[x^2] - mean^2."""
    inv_n = 1.0 / HW
    mean = jnp.sum(y, axis=-1, keepdims=True) * inv_n
    mean_sq = jnp.sum(y * y, axis=-1, keepdims=True) * inv_n
    var = mean_sq - mean * mean
    return (y - mean) * lax.rsqrt(var + EPS)


def _resnet_block_kernel(x_ref, w1_ref, w2_ref, out_ref, *, H, W, C):
    HW = H * W
    x = x_ref[0]                                    # (C, H*W) f32
    col_masks = _make_col_masks(H, W, C)

    # conv1 -> instance norm -> relu  (conv input cast to bf16 once)
    y = _conv3x3_reflect(x.astype(jnp.bfloat16), w1_ref[...], col_masks, H, W, C)
    y = jnp.maximum(_instance_norm(y, HW), 0.0)

    # conv2 -> instance norm
    z = _conv3x3_reflect(y.astype(jnp.bfloat16), w2_ref[...], col_masks, H, W, C)
    z = _instance_norm(z, HW)

    # residual add on the exact f32 input; lane-dense (1, C, H*W) store.
    out_ref[...] = (x + z).reshape(1, C, HW)


def resnet_block(x_nchw, w1, b1, w2, b2):
    """ResnetBlock forward.

    x_nchw: (B, C, H, W) float32 (consumed in native NCHW layout -- no
            transposes; only free reshapes).
    w1, w2: (3, 3, C, C) HWIO (a torch (O, I, 3, 3) weight transposed (2,3,1,0)).
    b1, b2: (C,) -- accepted for API parity but intentionally unused: with
            InstanceNorm2d(affine=False) the per-channel mean subtraction
            exactly cancels any per-channel constant added by the conv bias.
    """
    del b1, b2
    B, C, H, W = x_nchw.shape
    HW = H * W
    x_flat = x_nchw.reshape(B, C, HW).astype(jnp.float32)   # free: same HBM bytes

    def fold(w):
        # HWIO (3,3,Ci,Co) -> (Co, 9*Ci) bf16 with k = (dy*3 + dx)*Ci + ci.
        return jnp.transpose(w, (3, 0, 1, 2)).reshape(C, 9 * C).astype(jnp.bfloat16)

    w1f, w2f = fold(w1), fold(w2)

    kernel = functools.partial(_resnet_block_kernel, H=H, W=W, C=C)

    out_flat = pl.pallas_call(
        kernel,
        out_shape=jax.ShapeDtypeStruct((B, C, HW), jnp.float32),
        grid_spec=pltpu.PrefetchScalarGridSpec(
            num_scalar_prefetch=0,
            grid=(B,),
            in_specs=[
                pl.BlockSpec((1, C, HW), lambda b: (b, 0, 0)),   # x (f32, lane-dense)
                pl.BlockSpec((C, 9 * C), lambda b: (0, 0)),      # w1 (bf16, constant)
                pl.BlockSpec((C, 9 * C), lambda b: (0, 0)),      # w2 (bf16, constant)
            ],
            out_specs=pl.BlockSpec((1, C, HW), lambda b: (b, 0, 0)),
            # no scratch: everything stays in SSA values / vregs
        ),
        compiler_params=pltpu.CompilerParams(
            dimension_semantics=("parallel",),        # batch across TensorCores
            vmem_limit_bytes=48 * 1024 * 1024,        # headroom under v7x 64 MiB
        ),
    )(x_flat, w1f, w2f)

    return out_flat.reshape(B, C, H, W)               # free: same HBM bytes


# ----------------------------- pure-JAX references ----------------------------
def _ref_instance_norm_nhwc(y):
    mean = jnp.mean(y, axis=(1, 2), keepdims=True)
    var = jnp.mean((y - mean) ** 2, axis=(1, 2), keepdims=True)
    return (y - mean) * lax.rsqrt(var + EPS)


def resnet_block_ref(x_nchw, w1, b1, w2, b2, conv_dtype):
    """Faithful reference (keeps the conv biases).  conv_dtype selects the conv
    operand precision: bf16 mirrors the kernel's MXU path, f32 is exact."""
    x = jnp.transpose(x_nchw, (0, 2, 3, 1))
    dn = ("NHWC", "HWIO", "NHWC")

    def conv(inp, w, b):
        p = jnp.pad(inp, ((0, 0), (1, 1), (1, 1), (0, 0)), mode="reflect")
        o = lax.conv_general_dilated(
            p.astype(conv_dtype), w.astype(conv_dtype), (1, 1), "VALID",
            dimension_numbers=dn, preferred_element_type=jnp.float32)
        return o + b

    y = jnp.maximum(_ref_instance_norm_nhwc(conv(x, w1, b1)), 0.0)
    z = _ref_instance_norm_nhwc(conv(y, w2, b2))
    return jnp.transpose(x + z, (0, 3, 1, 2))


if __name__ == "__main__":
    B, C, H, W = 2, 8, 16, 16   # dim=8; H*W = 256 -> fully lane-dense layout

    key = jax.random.PRNGKey(0)
    kx, kw1, kb1, kw2, kb2 = jax.random.split(key, 5)

    x = jax.random.normal(kx, (B, C, H, W), dtype=jnp.float32)
    w1 = 0.1 * jax.random.normal(kw1, (3, 3, C, C), dtype=jnp.float32)
    b1 = 0.1 * jax.random.normal(kb1, (C,), dtype=jnp.float32)
    w2 = 0.1 * jax.random.normal(kw2, (3, 3, C, C), dtype=jnp.float32)
    b2 = 0.1 * jax.random.normal(kb2, (C,), dtype=jnp.float32)

    out = jax.block_until_ready(resnet_block(x, w1, b1, w2, b2))
    assert out.shape == (B, C, H, W)

    # 1) Matched-precision reference (bf16 conv operands, f32 accumulation,
    #    biases KEPT): tighter tolerance.  Catches layout/indexing bugs and
    #    proves the bias drop is exactly cancelled by InstanceNorm.  Agreement
    #    cannot be made arbitrarily tight across implementations because the
    #    inter-conv activation is independently re-quantized to bf16.
    ref_bf16 = jax.block_until_ready(
        resnet_block_ref(x, w1, b1, w2, b2, jnp.bfloat16))
    err_bf16 = jnp.max(jnp.abs(out - ref_bf16))
    assert jnp.allclose(out, ref_bf16, atol=5e-3, rtol=5e-3), \
        f"max abs diff vs matched-precision reference {err_bf16}"

    # 2) Pure-f32 reference (biases kept): looser tolerance covering only the
    #    kernel's bf16 MXU-operand rounding.
    ref_f32 = jax.block_until_ready(
        resnet_block_ref(x, w1, b1, w2, b2, jnp.float32))
    err_f32 = jnp.max(jnp.abs(out - ref_f32))
    assert jnp.allclose(out, ref_f32, atol=2e-2, rtol=2e-2), \
        f"max abs diff vs f32 reference {err_f32}"

    print("KERNEL_OK")
</pallas_src>

<mosaic_0001>
module attributes {stable_mosaic.version = 11 : i64} {
  func.func @_resnet_block_kernel(%arg0: i32, %arg1: memref<1x8x256xf32, #tpu.memory_space<vmem>>, %arg2: memref<8x72xbf16, #tpu.memory_space<vmem>>, %arg3: memref<8x72xbf16, #tpu.memory_space<vmem>>, %arg4: memref<1x8x256xf32, #tpu.memory_space<vmem>>) attributes {dimension_semantics = [#tpu.dimension_semantics<parallel>], iteration_bounds = array<i64: 2>, scalar_prefetch = 0 : i64, scratch_operands = 0 : i64, tpu.core_type = #tpu.core_type<tc>, window_params = [{transform_indices = @transform_0, window_bounds = array<i64: 1, 8, 256>}, {pipeline_mode = #tpu.pipeline_mode<synchronous>, transform_indices = @transform_1, window_bounds = array<i64: 8, 72>}, {pipeline_mode = #tpu.pipeline_mode<synchronous>, transform_indices = @transform_2, window_bounds = array<i64: 8, 72>}, {transform_indices = @transform_3, window_bounds = array<i64: 1, 8, 256>}]} {
    %c0 = arith.constant 0 : index
    %c0_0 = arith.constant 0 : index
    %c0_1 = arith.constant 0 : index
    %0 = vector.load %arg1[%c0, %c0_0, %c0_1] : memref<1x8x256xf32, #tpu.memory_space<vmem>>, vector<1x8x256xf32>
    %1 = vector.shape_cast %0 : vector<1x8x256xf32> to vector<8x256xf32>
    %2 = tpu.iota {dimensions = array<i32: 1>} : vector<8x288xi32>
    %c15_i32 = arith.constant 15 : i32
    %3 = vector.broadcast %c15_i32 : i32 to vector<8x288xi32>
    %4 = arith.andi %2, %3 : vector<8x288xi32>
    %c0_i32 = arith.constant 0 : i32
    %5 = vector.broadcast %c0_i32 : i32 to vector<8x288xi32>
    %6 = arith.cmpi eq, %4, %5 : vector<8x288xi32>
    %c15_i32_2 = arith.constant 15 : i32
    %7 = vector.broadcast %c15_i32_2 : i32 to vector<8x288xi32>
    %8 = arith.cmpi eq, %4, %7 : vector<8x288xi32>
    %9 = arith.truncf %1 : vector<8x256xf32> to vector<8x256xbf16>
    %c0_3 = arith.constant 0 : index
    %c0_4 = arith.constant 0 : index
    %10 = vector.load %arg2[%c0_3, %c0_4] : memref<8x72xbf16, #tpu.memory_space<vmem>>, vector<8x72xbf16>
    %11 = vector.extract_strided_slice %9 {offsets = [0, 16], sizes = [8, 16], strides = [1, 1]} : vector<8x256xbf16> to vector<8x16xbf16>
    %12 = vector.extract_strided_slice %9 {offsets = [0, 224], sizes = [8, 16], strides = [1, 1]} : vector<8x256xbf16> to vector<8x16xbf16>
    %13 = tpu.concatenate %11, %9, %12 in 1 : vector<8x16xbf16>, vector<8x256xbf16>, vector<8x16xbf16> -> vector<8x288xbf16>
    %14 = vector.extract_strided_slice %13 {offsets = [0, 287], sizes = [8, 1], strides = [1, 1]} : vector<8x288xbf16> to vector<8x1xbf16>
    %15 = vector.extract_strided_slice %13 {offsets = [0, 0], sizes = [8, 287], strides = [1, 1]} : vector<8x288xbf16> to vector<8x287xbf16>
    %16 = tpu.concatenate %14, %15 in 1 : vector<8x1xbf16>, vector<8x287xbf16> -> vector<8x288xbf16>
    %17 = vector.extract_strided_slice %13 {offsets = [0, 1], sizes = [8, 287], strides = [1, 1]} : vector<8x288xbf16> to vector<8x287xbf16>
    %18 = vector.extract_strided_slice %13 {offsets = [0, 0], sizes = [8, 1], strides = [1, 1]} : vector<8x288xbf16> to vector<8x1xbf16>
    %19 = tpu.concatenate %17, %18 in 1 : vector<8x287xbf16>, vector<8x1xbf16> -> vector<8x288xbf16>
    %20 = arith.select %6, %19, %16 : vector<8x288xi1>, vector<8x288xbf16>
    %21 = arith.select %8, %16, %19 : vector<8x288xi1>, vector<8x288xbf16>
    %22 = vector.extract_strided_slice %20 {offsets = [0, 0], sizes = [8, 256], strides = [1, 1]} : vector<8x288xbf16> to vector<8x256xbf16>
    %23 = vector.extract_strided_slice %13 {offsets = [0, 0], sizes = [8, 256], strides = [1, 1]} : vector<8x288xbf16> to vector<8x256xbf16>
    %24 = vector.extract_strided_slice %21 {offsets = [0, 0], sizes = [8, 256], strides = [1, 1]} : vector<8x288xbf16> to vector<8x256xbf16>
    %25 = vector.extract_strided_slice %20 {offsets = [0, 16], sizes = [8, 256], strides = [1, 1]} : vector<8x288xbf16> to vector<8x256xbf16>
    %26 = vector.extract_strided_slice %13 {offsets = [0, 16], sizes = [8, 256], strides = [1, 1]} : vector<8x288xbf16> to vector<8x256xbf16>
    %27 = vector.extract_strided_slice %21 {offsets = [0, 16], sizes = [8, 256], strides = [1, 1]} : vector<8x288xbf16> to vector<8x256xbf16>
    %28 = vector.extract_strided_slice %20 {offsets = [0, 32], sizes = [8, 256], strides = [1, 1]} : vector<8x288xbf16> to vector<8x256xbf16>
    %29 = vector.extract_strided_slice %13 {offsets = [0, 32], sizes = [8, 256], strides = [1, 1]} : vector<8x288xbf16> to vector<8x256xbf16>
    %30 = vector.extract_strided_slice %21 {offsets = [0, 32], sizes = [8, 256], strides = [1, 1]} : vector<8x288xbf16> to vector<8x256xbf16>
    %31 = tpu.concatenate %22, %23, %24, %25, %26, %27, %28, %29, %30 in 0 : vector<8x256xbf16>, vector<8x256xbf16>, vector<8x256xbf16>, vector<8x256xbf16>, vector<8x256xbf16>, vector<8x256xbf16>, vector<8x256xbf16>, vector<8x256xbf16>, vector<8x256xbf16> -> vector<72x256xbf16>
    %cst = arith.constant dense<0.000000e+00> : vector<8x256xf32>
    %32 = tpu.matmul %10, %31, %cst {dimension_numbers = #tpu.dot_dimension_numbers<[1], [0], [0], [1], [0, 0, 1, 1], [], []>} : vector<8x72xbf16>, vector<72x256xbf16>, vector<8x256xf32> -> vector<8x256xf32>
    %cst_5 = arith.constant dense<0.000000e+00> : vector<8xf32>
    %33 = vector.multi_reduction <add>, %32, %cst_5 [1] : vector<8x256xf32> to vector<8xf32>
    %34 = vector.shape_cast %33 : vector<8xf32> to vector<8x1xf32>
    %cst_6 = arith.constant 3.906250e-03 : f32
    %35 = vector.broadcast %cst_6 : f32 to vector<8x1xf32>
    %36 = arith.mulf %34, %35 : vector<8x1xf32>
    %37 = arith.mulf %32, %32 : vector<8x256xf32>
    %cst_7 = arith.constant dense<0.000000e+00> : vector<8xf32>
    %38 = vector.multi_reduction <add>, %37, %cst_7 [1] : vector<8x256xf32> to vector<8xf32>
    %39 = vector.shape_cast %38 : vector<8xf32> to vector<8x1xf32>
    %cst_8 = arith.constant 3.906250e-03 : f32
    %40 = vector.broadcast %cst_8 : f32 to vector<8x1xf32>
    %41 = arith.mulf %39, %40 : vector<8x1xf32>
    %42 = arith.mulf %36, %36 : vector<8x1xf32>
    %43 = arith.subf %41, %42 : vector<8x1xf32>
    %44 = vector.broadcast %36 : vector<8x1xf32> to vector<8x256xf32>
    %45 = arith.subf %32, %44 : vector<8x256xf32>
    %cst_9 = arith.constant 9.99999974E-6 : f32
    %46 = vector.broadcast %cst_9 : f32 to vector<8x1xf32>
    %47 = arith.addf %43, %46 : vector<8x1xf32>
    %48 = math.rsqrt %47 : vector<8x1xf32>
    %49 = vector.broadcast %48 : vector<8x1xf32> to vector<8x256xf32>
    %50 = arith.mulf %45, %49 : vector<8x256xf32>
    %cst_10 = arith.constant 0.000000e+00 : f32
    %51 = vector.broadcast %cst_10 : f32 to vector<8x256xf32>
    %52 = arith.maximumf %50, %51 : vector<8x256xf32>
    %53 = arith.truncf %52 : vector<8x256xf32> to vector<8x256xbf16>
    %c0_11 = arith.constant 0 : index
    %c0_12 = arith.constant 0 : index
    %54 = vector.load %arg3[%c0_11, %c0_12] : memref<8x72xbf16, #tpu.memory_space<vmem>>, vector<8x72xbf16>
    %55 = vector.extract_strided_slice %53 {offsets = [0, 16], sizes = [8, 16], strides = [1, 1]} : vector<8x256xbf16> to vector<8x16xbf16>
    %56 = vector.extract_strided_slice %53 {offsets = [0, 224], sizes = [8, 16], strides = [1, 1]} : vector<8x256xbf16> to vector<8x16xbf16>
    %57 = tpu.concatenate %55, %53, %56 in 1 : vector<8x16xbf16>, vector<8x256xbf16>, vector<8x16xbf16> -> vector<8x288xbf16>
    %58 = vector.extract_strided_slice %57 {offsets = [0, 287], sizes = [8, 1], strides = [1, 1]} : vector<8x288xbf16> to vector<8x1xbf16>
    %59 = vector.extract_strided_slice %57 {offsets = [0, 0], sizes = [8, 287], strides = [1, 1]} : vector<8x288xbf16> to vector<8x287xbf16>
    %60 = tpu.concatenate %58, %59 in 1 : vector<8x1xbf16>, vector<8x287xbf16> -> vector<8x288xbf16>
    %61 = vector.extract_strided_slice %57 {offsets = [0, 1], sizes = [8, 287], strides = [1, 1]} : vector<8x288xbf16> to vector<8x287xbf16>
    %62 = vector.extract_strided_slice %57 {offsets = [0, 0], sizes = [8, 1], strides = [1, 1]} : vector<8x288xbf16> to vector<8x1xbf16>
    %63 = tpu.concatenate %61, %62 in 1 : vector<8x287xbf16>, vector<8x1xbf16> -> vector<8x288xbf16>
    %64 = arith.select %6, %63, %60 : vector<8x288xi1>, vector<8x288xbf16>
    %65 = arith.select %8, %60, %63 : vector<8x288xi1>, vector<8x288xbf16>
    %66 = vector.extract_strided_slice %64 {offsets = [0, 0], sizes = [8, 256], strides = [1, 1]} : vector<8x288xbf16> to vector<8x256xbf16>
    %67 = vector.extract_strided_slice %57 {offsets = [0, 0], sizes = [8, 256], strides = [1, 1]} : vector<8x288xbf16> to vector<8x256xbf16>
    %68 = vector.extract_strided_slice %65 {offsets = [0, 0], sizes = [8, 256], strides = [1, 1]} : vector<8x288xbf16> to vector<8x256xbf16>
    %69 = vector.extract_strided_slice %64 {offsets = [0, 16], sizes = [8, 256], strides = [1, 1]} : vector<8x288xbf16> to vector<8x256xbf16>
    %70 = vector.extract_strided_slice %57 {offsets = [0, 16], sizes = [8, 256], strides = [1, 1]} : vector<8x288xbf16> to vector<8x256xbf16>
    %71 = vector.extract_strided_slice %65 {offsets = [0, 16], sizes = [8, 256], strides = [1, 1]} : vector<8x288xbf16> to vector<8x256xbf16>
    %72 = vector.extract_strided_slice %64 {offsets = [0, 32], sizes = [8, 256], strides = [1, 1]} : vector<8x288xbf16> to vector<8x256xbf16>
    %73 = vector.extract_strided_slice %57 {offsets = [0, 32], sizes = [8, 256], strides = [1, 1]} : vector<8x288xbf16> to vector<8x256xbf16>
    %74 = vector.extract_strided_slice %65 {offsets = [0, 32], sizes = [8, 256], strides = [1, 1]} : vector<8x288xbf16> to vector<8x256xbf16>
    %75 = tpu.concatenate %66, %67, %68, %69, %70, %71, %72, %73, %74 in 0 : vector<8x256xbf16>, vector<8x256xbf16>, vector<8x256xbf16>, vector<8x256xbf16>, vector<8x256xbf16>, vector<8x256xbf16>, vector<8x256xbf16>, vector<8x256xbf16>, vector<8x256xbf16> -> vector<72x256xbf16>
    %cst_13 = arith.constant dense<0.000000e+00> : vector<8x256xf32>
    %76 = tpu.matmul %54, %75, %cst_13 {dimension_numbers = #tpu.dot_dimension_numbers<[1], [0], [0], [1], [0, 0, 1, 1], [], []>} : vector<8x72xbf16>, vector<72x256xbf16>, vector<8x256xf32> -> vector<8x256xf32>
    %cst_14 = arith.constant dense<0.000000e+00> : vector<8xf32>
    %77 = vector.multi_reduction <add>, %76, %cst_14 [1] : vector<8x256xf32> to vector<8xf32>
    %78 = vector.shape_cast %77 : vector<8xf32> to vector<8x1xf32>
    %cst_15 = arith.constant 3.906250e-03 : f32
    %79 = vector.broadcast %cst_15 : f32 to vector<8x1xf32>
    %80 = arith.mulf %78, %79 : vector<8x1xf32>
    %81 = arith.mulf %76, %76 : vector<8x256xf32>
    %cst_16 = arith.constant dense<0.000000e+00> : vector<8xf32>
    %82 = vector.multi_reduction <add>, %81, %cst_16 [1] : vector<8x256xf32> to vector<8xf32>
    %83 = vector.shape_cast %82 : vector<8xf32> to vector<8x1xf32>
    %cst_17 = arith.constant 3.906250e-03 : f32
    %84 = vector.broadcast %cst_17 : f32 to vector<8x1xf32>
    %85 = arith.mulf %83, %84 : vector<8x1xf32>
    %86 = arith.mulf %80, %80 : vector<8x1xf32>
    %87 = arith.subf %85, %86 : vector<8x1xf32>
    %88 = vector.broadcast %80 : vector<8x1xf32> to vector<8x256xf32>
    %89 = arith.subf %76, %88 : vector<8x256xf32>
    %cst_18 = arith.constant 9.99999974E-6 : f32
    %90 = vector.broadcast %cst_18 : f32 to vector<8x1xf32>
    %91 = arith.addf %87, %90 : vector<8x1xf32>
    %92 = math.rsqrt %91 : vector<8x1xf32>
    %93 = vector.broadcast %92 : vector<8x1xf32> to vector<8x256xf32>
    %94 = arith.mulf %89, %93 : vector<8x256xf32>
    %95 = arith.addf %1, %94 : vector<8x256xf32>
    %96 = vector.shape_cast %95 : vector<8x256xf32> to vector<1x8x256xf32>
    %c0_19 = arith.constant 0 : index
    %c0_20 = arith.constant 0 : index
    %c0_21 = arith.constant 0 : index
    %97 = vector.load %arg4[%c0_19, %c0_20, %c0_21] : memref<1x8x256xf32, #tpu.memory_space<vmem>>, vector<1x8x256xf32>
    tpu.vector_store %arg4[%c0_19, %c0_20, %c0_21], %96 {strides = array<i32>} : memref<1x8x256xf32, #tpu.memory_space<vmem>>, vector<1x8x256xf32>,
    return
  }
  func.func @transform_0(%arg0: i32) -> (i32, i32, i32) {
    %c0_i32 = arith.constant 0 : i32
    %c0_i32_0 = arith.constant 0 : i32
    %c0_i32_1 = arith.constant 0 : i32
    return %arg0, %c0_i32, %c0_i32_0 : i32, i32, i32
  }
  func.func @transform_1(%arg0: i32) -> (i32, i32) {
    %c0_i32 = arith.constant 0 : i32
    %c0_i32_0 = arith.constant 0 : i32
    %c0_i32_1 = arith.constant 0 : i32
    return %c0_i32, %c0_i32_0 : i32, i32
  }
  func.func @transform_2(%arg0: i32) -> (i32, i32) {
    %c0_i32 = arith.constant 0 : i32
    %c0_i32_0 = arith.constant 0 : i32
    %c0_i32_1 = arith.constant 0 : i32
    return %c0_i32, %c0_i32_0 : i32, i32
  }
  func.func @transform_3(%arg0: i32) -> (i32, i32, i32) {
    %c0_i32 = arith.constant 0 : i32
    %c0_i32_0 = arith.constant 0 : i32
    %c0_i32_1 = arith.constant 0 : i32
    return %arg0, %c0_i32, %c0_i32_0 : i32, i32, i32
  }
}

</mosaic_0001>

<bundles_post_ra>
// kernel: tpu_custom_call.1
= control target key start
LH: loop header
LB: loop body
LE: loop exit
PB: predicated region body
PF: predicated region fallthrough
CT: control target
= control target key end

     0   :  { %8 = vsyncpa [#allocation3], 0  ;;  %s1481_s0 = inlined_call_operand.hbm [shape: f32[2,8,256], index: 0, kind: input, shape index: {}]   ;;  %s1482_s1 = inlined_call_operand.hbm [shape: bf16[8,72], index: 1, kind: input, shape index: {}]   ;;  %s1483_s2 = inlined_call_operand.vmem [shape: bf16[8,72], index: 2, kind: input, shape index: {}]   ;;  %s1484_s3 = inlined_call_operand.hbm [shape: f32[2,8,256], index: 3, kind: output, shape index: {}]  }
   0x1   :  { %10 = vsyncpa [#allocation3 + $0x1], 0 }
   0x2   :  { %11 = vsyncpa [#allocation6], 0 }
   0x3   :  { %12 = vsyncpa [#allocation4], 0 }
   0x4   :  { %14 = vsyncpa [#allocation4 + $0x1], 0  ;;  %s1067_s12 = smov 0   ;;  %s1069_s13 = smov 0  }
   0x5   :  { %s1071_s14 = smov 0   ;;  %s1073_s15 = smov 0  }
   0x6 LB: > { %s1088_s16 = sadd.s32 4294967295, %s1033_s15   ;;  %s813_s17 = sadd.s32 4294967294, %s1033_s15   ;;  %s1033_s15 = sphi %s1073_s15, %s1518_s15   ;;  %s1029_s14 = sphi %s1071_s14, %s1517_s14   ;;  %s1025_s13 = sphi %s1069_s13, %s1516_s13   ;;  %s1021_s12 = sphi %s1067_s12, %s1515_s12  }
   0x7   : > { %p40_p0 = scmp.ne.s32.totalorder %s1025_s13, %s1021_s12  ;;  %p1485_p1 = scmp.eq.s32.totalorder %s1088_s16, 0 }
   0x8   : > { %p112_p3 = scmp.eq.s32.totalorder %s813_s17, 1  ;;  %p814_p5 = scmp.ge.s32.totalorder %s1033_s15, 1 }
   0x9   : > { %p1097_p4 = por %p1485_p1, %p40_p0  ;;  %p119_p7 = scmp.lt.s32.totalorder %s1033_s15, 3 }
   0xa   : > { %p1102_p6 = por %p112_p3, %p40_p0  ;;  %s1035_s21 = smov [#allocation5]  }
   0xb   : > { %s1488_s18 = scalar_select %p1097_p4, 1, 0 }
   0xc   : > { %s1489_s19 = scalar_select %p1102_p6, 1, 0 }
   0xd   : > { %p1107_p8 = pnand %p814_p5, %p119_p7  ;;  %s132_s22 = sshll.u32 %s1035_s21, 4  ;;  %s133_s22 = int_to_ptr.vmem [resolvable:$true] %s132_s22 }
   0xe   : > { %s1115_s23 = sadd.s32 1, %s1033_s15   ;;  %s27_s27 = sadd.s32 1, %s1029_s14 }
   0xf   : > { %s1490_s20 = scalar_select %p1107_p8, 1, 0 }
  0x10   : > { %p843_p10 = pneg %p1107_p8  ;;  %s24_s25 = ssub.s32 %s1033_s15, %s1115_s23 }
  0x11   : > { %p1125_p12 = scmp.eq.s32.totalorder %s24_s25, 0  ;;  %s905_s30 = scalar_lea.hbm %s1482_s1, 64 }
  0x12   : > { %p1119_p11 = pnand %p843_p10, %p1485_p1  ;;  %p906_p0 = scmp.ne.s32.totalorder %s1482_s1, %s905_s30 }
  0x13   : > { %s1492_s26 = scalar_select %p1125_p12, 1, 0 }
  0x14   : > { %p907_p3 = pneg %p1119_p11  ;;  %p912_p10 = scmp.lt.u32.totalorder %s905_s30, %s1482_s1 }
  0x16   : > { %p908_p5 = pnand %p907_p3, %p906_p0 }
  0x18   : > { %p909_p7 = pneg %p908_p5 }
  0x1a   : > { %p914_p9 = pnand %p912_p10, %p909_p7 }
  0x1c   : > { %917 = shalt.err (!%p914_p9)
}
  0x1d   : > { %s918_s8 = scalar_lea.vmem %s133_s22, 64  ;;  %p926_p6 = scmp.lt.s32.totalorder %s133_s22, %s133_s22 }
  0x1e   : > { %p919_p1 = scmp.ne.s32.totalorder %s133_s22, %s918_s8  ;;  %p927_p4 = scmp.lt.s32.totalorder %s918_s8, %s918_s8 }
  0x20   : > { %p921_p2 = pnand %p919_p1, %p907_p3  ;;  %p928_p8 = por %p927_p4, %p926_p6 }
  0x22   : > { %p922_p13 = pneg %p921_p2 }
  0x24   : > { %p929_p12 = pnand %p928_p8, %p922_p13 }
  0x26   : > { %932 = shalt.err (!%p929_p12)
}
  0x27   : > { %846 = dma.hbm_to_vmem [thread:$0]  (!%p1119_p11), %s1482_s1, 64, %s133_s22, [#allocation6]  }
  0x28   : > { %p1493_p1 = scmp.ne.s32.totalorder %s1492_s26, 0  ;;  %p35_p2 = scmp.eq.s32.totalorder %s1033_s15, 0 }
  0x29   : > { %p1494_p4 = scmp.ne.s32.totalorder %s1029_s14, %s1025_s13  ;;  %p1495_p6 = scmp.eq.s32.totalorder %s1088_s16, 1 }
  0x2a   : > { %s1151_s11 = scalar_select %p1493_p1, %s1029_s14, %s27_s27  }
  0x2b   : > { %p1159_p8 = por %p1495_p6, %p1494_p4  ;;  %p856_p9 = scmp.lt.s32.totalorder %s1033_s15, 2 }
  0x2c   : > { %s146_s21 = sand.u32 1, %s1029_s14   ;;  %p1497_p12 = pmov %p1494_p4 }
  0x2d   : > { %s817_s24 = sshll.u32 %s146_s21, 4  ;;  %s833_s25 = sshll.u32 %s1033_s15, 8 }
  0x2e   : > { %p36_p13 = por %p35_p2, %p1497_p12  ;;  %s1172_s22 = scalar_lea.hbm %s1481_s0, %s833_s25 }
  0x2f   : > { %s150_s26 = scalar_lea.vmem [#allocation2], %s817_s24  ;;  %s147_s4 = scalar_lea.sflag [#allocation3], %s146_s21 }
  0x30   : > { %s158_s27 = sshll.u32 %s150_s26, 4  ;;  %p1174_p11 = pnand %p856_p9, %p36_p13  ;;  %s1178_s27 = int_to_ptr.vmem [resolvable:$true] %s158_s27 }
  0x31   : > { %s933_s5 = scalar_lea.hbm %s1172_s22, 256  ;;  %s938_s8 = scalar_lea.hbm %s1481_s0, 512 }
  0x32   : > { %p934_p0 = scmp.ne.s32.totalorder %s1172_s22, %s933_s5  ;;  %p935_p3 = pneg %p1174_p11 }
  0x33   : > { %p939_p10 = scmp.lt.u32.totalorder %s1172_s22, %s1481_s0  ;;  %p940_p1 = scmp.lt.u32.totalorder %s938_s8, %s933_s5 }
  0x34   : > { %p936_p5 = pnand %p935_p3, %p934_p0  ;;  %p942_p4 = scmp.lt.u32.totalorder %s933_s5, %s1172_s22 }
  0x35   : > { %p941_p2 = por %p940_p1, %p939_p10 }
  0x36   : > { %p937_p7 = pneg %p936_p5 }
  0x37   : > { %p943_p6 = por %p942_p4, %p941_p2 }
  0x39   : > { %p944_p9 = pnand %p943_p6, %p937_p7 }
  0x3b   : > { %947 = shalt.err (!%p944_p9)
}
  0x3c   : > { %s948_s21 = scalar_lea.vmem %s1178_s27, 256  ;;  %s1036_s24 = smov [#allocation2]  }
  0x3d   : > { %p949_p12 = scmp.ne.s32.totalorder %s1178_s27, %s948_s21  ;;  %s953_s25 = sshll.u32 %s1036_s24, 4  ;;  %s954_s25 = int_to_ptr.vmem [resolvable:$false] %s953_s25 }
  0x3e   : > { %s955_s28 = scalar_lea.vmem %s954_s25, 512  ;;  %p956_p5 = scmp.lt.s32.totalorder %s1178_s27, %s954_s25 }
  0x3f   : > { %p951_p13 = pnand %p949_p12, %p935_p3  ;;  %p957_p10 = scmp.lt.s32.totalorder %s955_s28, %s948_s21 }
  0x41   : > { %p952_p0 = pneg %p951_p13  ;;  %p958_p1 = por %p957_p10, %p956_p5 }
  0x43   : > { %p959_p2 = pnand %p958_p1, %p952_p0 }
  0x45   : > { %962 = shalt.err (!%p959_p2)
}
  0x46   : > { %850 = dma.hbm_to_vmem [thread:$0]  (!%p1174_p11), %s1172_s22, 256, %s1178_s27, %s147_s4  }
  0x47   : > { %p1499_p7 = scmp.ne.s32.totalorder %s1490_s20, 0 }
  0x48   : > { %s1208_s29 = sand.u32 (!%p1499_p7), 1, %s1025_s13   ;;  %p1500_p3 = scmp.ne.s32.totalorder (!%p1499_p7), %s1488_s18, 0 }
  0x49   : > { %167 = sbr.rel (%p1499_p7) target bundleno = 1641 (0x669), region = 32  ;;  %s821_s26 = sshll.u32 (!%p1499_p7), %s1208_s29, 4 }
  0x4a   : > { %s170_s5 = scalar_lea.sflag (!%p1499_p7), [#allocation3], %s1208_s29  ;;  %s173_s6 = scalar_lea.vmem (!%p1499_p7), [#allocation2], %s821_s26 }
  0x50   : > { %1008 = dma.done.wait (%p1500_p3), %s170_s5, 256  }
  0x51   : > { %1010 = vsyncadd (%p1500_p3), %s170_s5, 4294967040  ;;  %p1501_p11 = scmp.eq.s32.totalorder %s1088_s16, 0 }
  0x53   : > { %1012 = dma.done.wait (%p1501_p11), [#allocation6], 64   ;;  %p1502_p4 = pmov %p1501_p11 }
  0x54   : > { %v1222_v0 = vld [vmem:[%s173_s6 + $0x8] sm:$0xff]  ;;  %v1224_v1 = vld [vmem:[%s173_s6] sm:$0xff]  ;;  %s1037_s20 = smov 16   ;;  %s1038_s18 = smov 112   ;;  %v1040_v4 = vmov 0   ;;  %vm229_vm0 = vcmask 130048   ;;  %v205_v14 = vlaneseq }
  0x55   : > { %1014 = vsyncadd (%p1502_p4), [#allocation6], 4294967232  ;;  %v219_v2 = vpack.c.bf16 %v1222_v0, %v1222_v0  ;;  %v218_v3 = vpack.c.bf16 %v1224_v1, %v1224_v1  ;;  %s1039_s22 = smov 48   ;;  %462 = vmatprep.mubr.bf16.mxu0 %v1040_v4  ;;  %687 = vmatprep.mubr.bf16.mxu1 %v1040_v4  ;;  %s1041_s27 = smov 1   ;;  %vm250_vm11 = vcmask 7168   ;;  %vm266_vm12 = vcmask 1039360  }
  0x56   : > { %s1042_s30 = smov 127   ;;  %s1043_s4 = smov 31   ;;  %v206_v15 = vand.u32 127, %v205_v14  ;;  %v283_v21 = vshrl.u32 %v205_v14, 7  ;;  %vm273_vm13 = vcmask 252928  }
  0x57   : > { %227 = vrot.lane.b32.xlu1 %v219_v2, %s1037_s20  ;;  %222 = vrot.lane.b32.xlu0 %v218_v3, %s1038_s18  ;;  %s1044_s7 = smov 97   ;;  %s1045_s8 = smov 96  }
  0x58   : > { %v208_v16 = vadd.s32 256, %v206_v15  ;;  %v207_v17 = vadd.s32 128, %v206_v15  ;;  %v209_v19 = vand.u32 15, %v206_v15  ;;  %v284_v22 = vsub.s32 0, %v283_v21  ;;  %s834_s21 = sshll.u32 %s1088_s16, 8  ;;  %s199_s24 = scalar_lea.vmem [#allocation7], %s821_s26 }
  0x59   : > { %v288_v23 = vsub.s32 4, %v283_v21  ;;  %s733_s25 = sshll.u32 %s199_s24, 4  ;;  %s1437_s6 = scalar_lea.hbm %s1484_s3, %s834_s21  ;;  %s1439_s25 = int_to_ptr.vmem [resolvable:$true] %s733_s25 }
  0x5a   : > { %v211_v18 = vand.u32 15, %v208_v16  ;;  %v210_v20 = vand.u32 15, %v207_v17  ;;  %vm212_vm2 = vcmp.eq.s32.totalorder %v209_v19, 0  ;;  %vm215_vm6 = vcmp.eq.s32.totalorder %v209_v19, 15  ;;  %s719_s16 = scalar_lea.sflag [#allocation4], %s1208_s29  ;;  %s963_s26 = scalar_lea.vmem %s1439_s25, 256 }
  0x5b   : > { %231 = vrot.lane.b32.xlu1 %v219_v2, %s1039_s22  ;;  %225 = vrot.lane.b32.xlu0 %v218_v3, %s1037_s20  ;;  %p964_p6 = scmp.ne.s32.totalorder %s1439_s25, %s963_s26 }
  0x5c   : > { %vm214_vm1 = vcmp.eq.s32.totalorder %v211_v18, 0  ;;  %vm213_vm3 = vcmp.eq.s32.totalorder %v210_v20, 0  ;;  %vm216_vm7 = vcmp.eq.s32.totalorder %v210_v20, 15  ;;  %vm1266_vm9 = vcmp.eq.s32.totalorder %v211_v18, 15 }
  0x5d   : > { %vm279_vm4 = vmpackc.low %vm214_vm1, %vm214_vm1  ;;  %vm387_vm1 = vcmask 1043456   ;;  %p965_p9 = pnand %p964_p6, %p1159_p8 }
  0x5e   : > { %vm278_vm5 = vmpackc.low %vm213_vm3, %vm212_vm2  ;;  %v281_v26 = vsel %vm279_vm4, 65537, %v1040_v4 }
  0x5f   : > { %v280_v27 = vsel %vm278_vm5, 65537, %v1040_v4  ;;  %vm300_vm8 = vmpackc.low %vm216_vm7, %vm215_vm6  ;;  %v293_v29 = vrot.slane %v281_v26, %v284_v22  ;;  %vm336_vm6 = vcmask 916480   ;;  %vm367_vm7 = vcmask 785408   ;;  %p966_p12 = pneg %p965_p9 }
  0x60   : > { %v1270_v30 = vrot.slane %v280_v27, %v288_v23  ;;  %v302_v33 = vsel %vm300_vm8, 65537, %v1040_v4  ;;  %vm301_vm10 = vmpackc.low %vm1266_vm9, %vm1266_vm9  ;;  %v285_v36 = vrot.slane %v280_v27, %v284_v22  ;;  %vm420_vm8 = vcmask 588800  }
  0x61   : > { %v1276_v34 = vrot.slane %v302_v33, %v288_v23  ;;  %vm1278_vm14 = vcmp.ne.s16.totalorder %v293_v29, 0  ;;  %v303_v38 = vsel %vm301_vm10, 65537, %v1040_v4  ;;  %v307_v59 = vrot.slane %v302_v33, %v284_v22 }
  0x62   : > { %vm295_vm15 = vcmp.ne.s16.totalorder %v1270_v30, 0  ;;  %v315_v46 = vrot.slane %v303_v38, %v284_v22  ;;  %vm1296_vm3 = vcmp.ne.s16.totalorder %v285_v36, 0 }
  0x63   : > { %vm317_vm2 = vcmp.ne.s16.totalorder %v1276_v34, 0  ;;  %vm1316_vm5 = vcmp.ne.s16.totalorder %v307_v59, 0 }
  0x64   : > { %vm1307_vm4 = vcmp.ne.s16.totalorder %v315_v46, 0  ;;  %v220_v46 = vld [vmem:[#allocation5] sm:$0xf] }
  0xc9   : > { %v228_v5 = vpop.permute.xlu1 %227  ;;  %v223_v6 = vpop.permute.xlu0 %222 }
  0xcd   : > { %v226_v7 = vpop.permute.xlu0 %225  ;;  %v232_v10 = vpop.permute.xlu1 %231 }
  0xce   : > { %v1237_v8 = vsel %vm229_vm0, %v226_v7, %v228_v5  ;;  %v1240_v9 = vsel %vm229_vm0, %v223_v6, %v226_v7  ;;  %v239_v11 = vsel %vm229_vm0, %v228_v5, %v232_v10 }
  0xcf   : > { %244 = vrot.lane.b32.xlu0 %v1240_v9, %s1041_s27  ;;  %246 = vrot.lane.b32.xlu1 %v1237_v8, %s1041_s27  ;;  %v370_v12 = vrot.slane %v239_v11, 4  ;;  %v323_v13 = vrot.slane %v1237_v8, 4  ;;  %v322_v51 = vrot.slane %v1240_v9, 4 }
  0xd3   : > { %248 = vrot.lane.b32.xlu0 %v239_v11, %s1041_s27  ;;  %262 = vrot.lane.b32.xlu1 %v1237_v8, %s1042_s30 }
  0xd7   : > { %264 = vrot.lane.b32.xlu0 %v239_v11, %s1042_s30  ;;  %271 = vrot.lane.b32.xlu1 %v1240_v9, %s1043_s4 }
  0xdb   : > { %241 = vrot.lane.b32.xlu0 %v239_v11, %s1044_s7  ;;  %260 = vrot.lane.b32.xlu1 %v1240_v9, %s1042_s30 }
  0xdf   : > { %343 = vrot.lane.b32.xlu0 %v239_v11, %s1038_s18  ;;  %341 = vrot.lane.b32.xlu1 %v1237_v8, %s1038_s18 }
  0xe3   : > { %375 = vrot.lane.b32.xlu0 %v370_v12, %s1045_s8  ;;  %339 = vrot.lane.b32.xlu1 %v1240_v9, %s1038_s18 }
  0xe7   : > { %373 = vrot.lane.b32.xlu1 %v323_v13, %s1045_s8 }
 0x141   : > { %v245_v24 = vpop.permute.xlu0 %244  ;;  %v247_v25 = vpop.permute.xlu1 %246 }
 0x142   : > { %v251_v40 = vsel %vm250_vm11, %v245_v24, %v247_v25 }
 0x145   : > { %v249_v31 = vpop.permute.xlu0 %248  ;;  %v263_v32 = vpop.permute.xlu1 %262 }
 0x146   : > { %v252_v41 = vsel %vm250_vm11, %v247_v25, %v249_v31 }
 0x149   : > { %v265_v37 = vpop.permute.xlu0 %264  ;;  %v272_v39 = vpop.permute.xlu1 %271 }
 0x14a   : > { %v268_v42 = vsel %vm266_vm12, %v263_v32, %v265_v37  ;;  %v276_v43 = vsel %vm273_vm13, %v265_v37, %v272_v39 }
 0x14b   : > { %v299_v44 = vsel %vm1278_vm14, %v276_v43, %v252_v41  ;;  %v298_v45 = vsel %vm295_vm15, %v268_v42, %v251_v40  ;;  %v320_v56 = vsel %vm317_vm2, %v251_v40, %v268_v42  ;;  %v321_v63 = vsel %vm1307_vm4, %v252_v41, %v276_v43 }
 0x14c   : > { %365 = vrot.lane.b32.xlu0 %v299_v44, %s1045_s8  ;;  %363 = vrot.lane.b32.xlu1 %v298_v45, %s1045_s8  ;;  %v394_v47 = vsel %vm387_vm1, %v298_v45, %v323_v13  ;;  %v329_v52 = vrot.slane %v299_v44, 4  ;;  %v328_v55 = vrot.slane %v298_v45, 4  ;;  %v351_v62 = vrot.slane %v320_v56, 4 }
 0x14d   : > { %v242_v49 = vpop.permute.xlu0 %241  ;;  %v261_v50 = vpop.permute.xlu1 %260  ;;  %430 = vmatprep.subr.bf16.mxu0 %v394_v47  ;;  %v352_v3 = vrot.slane %v321_v63, 4 }
 0x14e   : > { %v258_v53 = vsel %vm250_vm11, %v242_v49, %v245_v24  ;;  %v267_v54 = vsel %vm266_vm12, %v261_v50, %v263_v32 }
 0x14f   : > { %v297_v57 = vsel %vm1296_vm3, %v267_v54, %v258_v53  ;;  %v319_v4 = vsel %vm1316_vm5, %v258_v53, %v267_v54 }
 0x150   : > { %332 = vrot.lane.b32.xlu0 %v328_v55, %s1038_s18  ;;  %334 = vrot.lane.b32.xlu1 %v329_v52, %s1038_s18  ;;  %v390_v60 = vsel %vm387_vm1, %v297_v57, %v322_v51  ;;  %v327_v61 = vrot.slane %v297_v57, 4  ;;  %v350_v5 = vrot.slane %v319_v4, 4 }
 0x151   : > { %431 = vmatpush1.bf16.msra.mxu0 %v390_v60  ;;  %v342_v6 = vpop.permute.xlu1 %341  ;;  %v344_v7 = vpop.permute.xlu0 %343 }
 0x152   : > { %v346_v23 = vsel %vm336_vm6, %v342_v6, %v344_v7 }
 0x154   : > { %330 = vrot.lane.b32.xlu0 %v327_v61, %s1038_s18  ;;  %355 = vrot.lane.b32.xlu1 %v351_v62, %s1038_s18 }
 0x155   : > { %v340_v8 = vpop.permute.xlu1 %339  ;;  %v376_v9 = vpop.permute.xlu0 %375 }
 0x156   : > { %v345_v28 = vsel %vm336_vm6, %v340_v8, %v342_v6 }
 0x158   : > { %357 = vrot.lane.b32.xlu0 %v352_v3, %s1038_s18  ;;  %361 = vrot.lane.b32.xlu1 %v297_v57, %s1045_s8 }
 0x159   : > { %v374_v10 = vpop.permute.xlu1 %373 }
 0x15a   : > { %v378_v31 = vsel %vm367_vm7, %v374_v10, %v376_v9 }
 0x15c   : > { %353 = vrot.lane.b32.xlu0 %v350_v5, %s1038_s18  ;;  %379 = vrot.lane.b32.xlu1 %v319_v4, %s1045_s8 }
 0x160   : > { %371 = vrot.lane.b32.xlu0 %v322_v51, %s1045_s8  ;;  %383 = vrot.lane.b32.xlu1 %v321_v63, %s1045_s8 }
 0x164   : > { %381 = vrot.lane.b32.xlu0 %v320_v56, %s1045_s8 }
 0x1be   : > { %v366_v11 = vpop.permute.xlu0 %365  ;;  %v364_v12 = vpop.permute.xlu1 %363 }
 0x1bf   : > { %v369_v26 = vsel %vm367_vm7, %v364_v12, %v366_v11 }
 0x1c0   : > { %v418_v36 = vsel %vm387_vm1, %v369_v26, %v378_v31 }
 0x1c2   : > { %v333_v13 = vpop.permute.xlu0 %332  ;;  %v335_v14 = vpop.permute.xlu1 %334 }
 0x1c3   : > { %v338_v15 = vsel %vm336_vm6, %v333_v13, %v335_v14 }
 0x1c4   : > { %v402_v16 = vsel %vm387_vm1, %v320_v56, %v338_v15 }
 0x1c5   : > { %432 = vmatprep.subr.bf16.mxu0 %v402_v16 }
 0x1c6   : > { %v331_v17 = vpop.permute.xlu0 %330  ;;  %v356_v18 = vpop.permute.xlu1 %355 }
 0x1c7   : > { %v337_v19 = vsel %vm336_vm6, %v331_v17, %v333_v13 }
 0x1c8   : > { %v398_v20 = vsel %vm387_vm1, %v319_v4, %v337_v19 }
 0x1c9   : > { %433 = vmatpush1.bf16.msra.mxu0 %v398_v20 }
 0x1ca   : > { %v358_v21 = vpop.permute.xlu0 %357  ;;  %v362_v22 = vpop.permute.xlu1 %361 }
 0x1cb   : > { %v360_v24 = vsel %vm336_vm6, %v356_v18, %v358_v21  ;;  %v368_v38 = vsel %vm367_vm7, %v362_v22, %v364_v12 }
 0x1cc   : > { %v410_v25 = vsel %vm387_vm1, %v346_v23, %v360_v24 }
 0x1cd   : > { %434 = vmatprep.subr.bf16.mxu0 %v410_v25 }
 0x1ce   : > { %v354_v27 = vpop.permute.xlu0 %353  ;;  %v380_v32 = vpop.permute.xlu1 %379 }
 0x1cf   : > { %v359_v29 = vsel %vm336_vm6, %v354_v27, %v356_v18 }
 0x1d0   : > { %v406_v33 = vsel %vm387_vm1, %v345_v28, %v359_v29 }
 0x1d1   : > { %435 = vmatpush1.bf16.msra.mxu0 %v406_v33 }
 0x1d2   : > { %v372_v37 = vpop.permute.xlu0 %371  ;;  %436 = vmatprep.subr.bf16.mxu0 %v418_v36  ;;  %v384_v41 = vpop.permute.xlu1 %383 }
 0x1d3   : > { %v377_v39 = vsel %vm367_vm7, %v372_v37, %v374_v10 }
 0x1d4   : > { %v414_v40 = vsel %vm387_vm1, %v368_v38, %v377_v39 }
 0x1d5   : > { %437 = vmatpush1.bf16.msra.mxu0 %v414_v40 }
 0x1d6   : > { %v382_v42 = vpop.permute.xlu0 %381 }
 0x1d7   : > { %v385_v43 = vsel %vm367_vm7, %v380_v32, %v382_v42  ;;  %v386_v44 = vsel %vm367_vm7, %v382_v42, %v384_v41 }
 0x1d8   : > { %824 = vmatprep.subr.msk.bf16.mxu0 %vm387_vm1, %v386_v44  ;;  %v425_v45 = vsel %vm387_vm1, %v385_v43, 0 }
 0x1d9   : > { %439 = vmatpush1.bf16.msra.mxu0 %v425_v45 }
 0x1dc   : > { %825 = vmatmul.mubr.msk.bf16.vlgmr.msra.gmra.mrb[0].mxu0 %vm420_vm8, %v220_v46 }
 0x2af   : > { %v464_v47 = vpop.f32.mrb[0].mxu0 }
 0x2b0   : > { %v466_v49 = vpop.f32.mrb[1].mxu0  ;;  %v475_v50 = vmul.f32 %v464_v47, %v464_v47 }
 0x2b1   : > { %v468_v51 = vpop.f32.mrb[2].mxu0  ;;  %v471_v52 = vadd.f32 %v466_v49, %v464_v47  ;;  %v476_v53 = vmul.f32 %v466_v49, %v466_v49 }
 0x2b2   : > { %v469_v54 = vpop.f32.mrb[3].mxu0 }
 0x2b3   : > { %472 = vadd.xlane.f32.xlu0 %v471_v52  ;;  %v477_v55 = vadd.f32 %v476_v53, %v475_v50 }
 0x2b5   : > { %478 = vadd.xlane.f32.xlu1 %v477_v55 }
 0x340   : > { %v473_v56 = vpop.xlane.xlu0 %472 }
 0x341   : > { %v474_v57 = vmul.f32 0.00390625, %v473_v56 }
 0x342   : > { %v479_v59 = vpop.xlane.xlu1 %478 }
 0x343   : > { %v480_v60 = vmul.f32 0.00390625, %v479_v59  ;;  %v481_v61 = vmul.f32 %v474_v57, %v474_v57  ;;  %v483_v3 = vsub.f32 %v464_v47, %v474_v57  ;;  %v484_v4 = vsub.f32 %v466_v49, %v474_v57 }
 0x345   : > { %v482_v62 = vsub.f32 %v480_v60, %v481_v61 }
 0x347   : > { %v485_v63 = vadd.f32 1e-05, %v482_v62 }
 0x349   : > { %901 = vrsqrt.f32 %v485_v63 }
 0x353   : > { %v902_v5 = vpop.eup %901 }
 0x354   : > { %v487_v6 = vmul.f32 %v902_v5, %v483_v3  ;;  %v488_v7 = vmul.f32 %v902_v5, %v484_v4 }
 0x356   : > { %v489_v8 = vmax.f32 %v487_v6, 0.0  ;;  %v490_v10 = vmax.f32 %v488_v7, 0.0 }
 0x358   : > { %v491_v9 = vpack.c.bf16 %v489_v8, %v489_v8  ;;  %v492_v11 = vpack.c.bf16 %v490_v10, %v490_v10 }
 0x35a   : > { %498 = vrot.lane.b32.xlu1 %v491_v9, %s1037_s20  ;;  %495 = vrot.lane.b32.xlu0 %v491_v9, %s1038_s18 }
 0x35e   : > { %503 = vrot.lane.b32.xlu1 %v492_v11, %s1039_s22  ;;  %500 = vrot.lane.b32.xlu0 %v492_v11, %s1037_s20  ;;  %s1046_s20 = smov [#allocation7]  }
 0x3cc   : > { %v499_v12 = vpop.permute.xlu1 %498  ;;  %v496_v13 = vpop.permute.xlu0 %495 }
 0x3cd   : > { %v507_v14 = vsel %vm229_vm0, %v496_v13, %v499_v12 }
 0x3ce   : > { %515 = vrot.lane.b32.xlu0 %v507_v14, %s1041_s27  ;;  %v551_v43 = vrot.slane %v507_v14, 4 }
 0x3d0   : > { %v504_v15 = vpop.permute.xlu1 %503  ;;  %v501_v16 = vpop.permute.xlu0 %500 }
 0x3d1   : > { %v502_v17 = vsel %vm229_vm0, %v499_v12, %v501_v16  ;;  %v510_v18 = vsel %vm229_vm0, %v501_v16, %v504_v15 }
 0x3d2   : > { %519 = vrot.lane.b32.xlu0 %v510_v18, %s1041_s27  ;;  %517 = vrot.lane.b32.xlu1 %v502_v17, %s1041_s27  ;;  %v597_v19 = vrot.slane %v510_v18, 4  ;;  %v552_v20 = vrot.slane %v502_v17, 4 }
 0x3d6   : > { %533 = vrot.lane.b32.xlu0 %v510_v18, %s1042_s30  ;;  %531 = vrot.lane.b32.xlu1 %v502_v17, %s1042_s30 }
 0x3da   : > { %512 = vrot.lane.b32.xlu0 %v510_v18, %s1044_s7  ;;  %539 = vrot.lane.b32.xlu1 %v507_v14, %s1043_s4 }
 0x3de   : > { %571 = vrot.lane.b32.xlu0 %v510_v18, %s1038_s18  ;;  %529 = vrot.lane.b32.xlu1 %v507_v14, %s1042_s30 }
 0x3e2   : > { %602 = vrot.lane.b32.xlu0 %v597_v19, %s1045_s8  ;;  %569 = vrot.lane.b32.xlu1 %v502_v17, %s1038_s18 }
 0x3e6   : > { %567 = vrot.lane.b32.xlu1 %v507_v14, %s1038_s18 }
 0x3ea   : > { %600 = vrot.lane.b32.xlu1 %v552_v20, %s1045_s8 }
 0x440   : > { %v516_v21 = vpop.permute.xlu0 %515 }
 0x444   : > { %v518_v22 = vpop.permute.xlu1 %517  ;;  %v520_v23 = vpop.permute.xlu0 %519 }
 0x445   : > { %v521_v26 = vsel %vm250_vm11, %v516_v21, %v518_v22  ;;  %v522_v32 = vsel %vm250_vm11, %v518_v22, %v520_v23 }
 0x448   : > { %v532_v24 = vpop.permute.xlu1 %531  ;;  %v534_v25 = vpop.permute.xlu0 %533 }
 0x449   : > { %v536_v27 = vsel %vm266_vm12, %v532_v24, %v534_v25 }
 0x44a   : > { %v546_v28 = vsel %vm295_vm15, %v536_v27, %v521_v26  ;;  %v549_v30 = vsel %vm317_vm2, %v521_v26, %v536_v27 }
 0x44b   : > { %591 = vrot.lane.b32.xlu1 %v546_v28, %s1045_s8  ;;  %v620_v29 = vsel %vm387_vm1, %v546_v28, %v552_v20  ;;  %v557_v42 = vrot.slane %v546_v28, 4  ;;  %v579_v45 = vrot.slane %v549_v30, 4 }
 0x44c   : > { %v540_v31 = vpop.permute.xlu1 %539  ;;  %655 = vmatprep.subr.bf16.mxu1 %v620_v29  ;;  %v513_v36 = vpop.permute.xlu0 %512 }
 0x44d   : > { %v543_v33 = vsel %vm273_vm13, %v534_v25, %v540_v31  ;;  %v527_v40 = vsel %vm250_vm11, %v513_v36, %v516_v21  ;;  %v493_v25 = vld [vmem:[%s1483_s2] sm:$0xf] }
 0x44e   : > { %v547_v37 = vsel %vm1278_vm14, %v543_v33, %v522_v32  ;;  %v550_v46 = vsel %vm1307_vm4, %v522_v32, %v543_v33 }
 0x44f   : > { %593 = vrot.lane.b32.xlu0 %v547_v37, %s1045_s8  ;;  %v558_v38 = vrot.slane %v547_v37, 4  ;;  %v580_v47 = vrot.slane %v550_v46, 4 }
 0x450   : > { %v530_v39 = vpop.permute.xlu1 %529  ;;  %v572_v51 = vpop.permute.xlu0 %571 }
 0x451   : > { %v535_v41 = vsel %vm266_vm12, %v530_v39, %v532_v24  ;;  %563 = vrot.lane.b32.xlu1 %v558_v38, %s1038_s18 }
 0x452   : > { %v545_v44 = vsel %vm1296_vm3, %v535_v41, %v527_v40  ;;  %v548_v48 = vsel %vm1316_vm5, %v527_v40, %v535_v41 }
 0x453   : > { %561 = vrot.lane.b32.xlu0 %v557_v42, %s1038_s18  ;;  %v616_v35 = vsel %vm387_vm1, %v545_v44, %v551_v43  ;;  %v556_v34 = vrot.slane %v545_v44, 4  ;;  %v578_v49 = vrot.slane %v548_v48, 4 }
 0x454   : > { %656 = vmatpush1.bf16.msra.mxu1 %v616_v35  ;;  %v570_v58 = vpop.permute.xlu1 %569  ;;  %v603_v53 = vpop.permute.xlu0 %602 }
 0x455   : > { %583 = vrot.lane.b32.xlu1 %v579_v45, %s1038_s18  ;;  %v574_v5 = vsel %vm336_vm6, %v570_v58, %v572_v51 }
 0x457   : > { %559 = vrot.lane.b32.xlu0 %v556_v34, %s1038_s18 }
 0x458   : > { %v568_v50 = vpop.permute.xlu1 %567 }
 0x459   : > { %589 = vrot.lane.b32.xlu1 %v545_v44, %s1045_s8  ;;  %v573_v10 = vsel %vm336_vm6, %v568_v50, %v570_v58 }
 0x45b   : > { %585 = vrot.lane.b32.xlu0 %v580_v47, %s1038_s18 }
 0x45c   : > { %v601_v52 = vpop.permute.xlu1 %600 }
 0x45d   : > { %606 = vrot.lane.b32.xlu1 %v548_v48, %s1045_s8  ;;  %v605_v12 = vsel %vm367_vm7, %v601_v52, %v603_v53 }
 0x45f   : > { %581 = vrot.lane.b32.xlu0 %v578_v49, %s1038_s18  ;;  %s967_s18 = sshll.u32 %s1046_s20, 4  ;;  %s968_s18 = int_to_ptr.vmem [resolvable:$false] %s967_s18 }
 0x460   : > { %s969_s22 = scalar_lea.vmem %s968_s18, 512  ;;  %p970_p13 = scmp.lt.s32.totalorder %s1439_s25, %s968_s18 }
 0x461   : > { %610 = vrot.lane.b32.xlu1 %v550_v46, %s1045_s8  ;;  %p971_p0 = scmp.lt.s32.totalorder %s969_s22, %s963_s26 }
 0x463   : > { %598 = vrot.lane.b32.xlu0 %v551_v43, %s1045_s8  ;;  %p972_p5 = por %p971_p0, %p970_p13 }
 0x465   : > { %p973_p10 = pnand %p972_p5, %p966_p12 }
 0x467   : > { %608 = vrot.lane.b32.xlu0 %v549_v30, %s1045_s8 }
 0x4bd   : > { %v592_v2 = vpop.permute.xlu1 %591 }
 0x4c1   : > { %v594_v54 = vpop.permute.xlu0 %593 }
 0x4c2   : > { %v596_v8 = vsel %vm367_vm7, %v592_v2, %v594_v54 }
 0x4c3   : > { %v564_v55 = vpop.permute.xlu1 %563  ;;  %v644_v15 = vsel %vm387_vm1, %v596_v8, %v605_v12 }
 0x4c5   : > { %v562_v56 = vpop.permute.xlu0 %561 }
 0x4c6   : > { %v566_v57 = vsel %vm336_vm6, %v562_v56, %v564_v55 }
 0x4c7   : > { %v584_v59 = vpop.permute.xlu1 %583  ;;  %v628_v60 = vsel %vm387_vm1, %v549_v30, %v566_v57 }
 0x4c8   : > { %657 = vmatprep.subr.bf16.mxu1 %v628_v60 }
 0x4c9   : > { %v560_v61 = vpop.permute.xlu0 %559 }
 0x4ca   : > { %v565_v62 = vsel %vm336_vm6, %v560_v61, %v562_v56 }
 0x4cb   : > { %v624_v63 = vsel %vm387_vm1, %v548_v48, %v565_v62  ;;  %v590_v3 = vpop.permute.xlu1 %589 }
 0x4cc   : > { %658 = vmatpush1.bf16.msra.mxu1 %v624_v63  ;;  %v595_v17 = vsel %vm367_vm7, %v590_v3, %v592_v2 }
 0x4cd   : > { %v586_v4 = vpop.permute.xlu0 %585 }
 0x4ce   : > { %v588_v6 = vsel %vm336_vm6, %v584_v59, %v586_v4 }
 0x4cf   : > { %v636_v7 = vsel %vm387_vm1, %v574_v5, %v588_v6  ;;  %v607_v13 = vpop.permute.xlu1 %606 }
 0x4d0   : > { %659 = vmatprep.subr.bf16.mxu1 %v636_v7 }
 0x4d1   : > { %v582_v9 = vpop.permute.xlu0 %581 }
 0x4d2   : > { %v587_v11 = vsel %vm336_vm6, %v582_v9, %v584_v59 }
 0x4d3   : > { %v632_v14 = vsel %vm387_vm1, %v573_v10, %v587_v11  ;;  %v611_v20 = vpop.permute.xlu1 %610 }
 0x4d4   : > { %660 = vmatpush1.bf16.msra.mxu1 %v632_v14 }
 0x4d5   : > { %661 = vmatprep.subr.bf16.mxu1 %v644_v15  ;;  %v599_v16 = vpop.permute.xlu0 %598 }
 0x4d6   : > { %v604_v18 = vsel %vm367_vm7, %v599_v16, %v601_v52 }
 0x4d7   : > { %v640_v19 = vsel %vm387_vm1, %v595_v17, %v604_v18 }
 0x4d8   : > { %662 = vmatpush1.bf16.msra.mxu1 %v640_v19 }
 0x4d9   : > { %v609_v21 = vpop.permute.xlu0 %608 }
 0x4da   : > { %v612_v22 = vsel %vm367_vm7, %v607_v13, %v609_v21  ;;  %v613_v23 = vsel %vm367_vm7, %v609_v21, %v611_v20 }
 0x4db   : > { %826 = vmatprep.subr.msk.bf16.mxu1 %vm387_vm1, %v613_v23  ;;  %v650_v24 = vsel %vm387_vm1, %v612_v22, 0 }
 0x4dc   : > { %664 = vmatpush1.bf16.msra.mxu1 %v650_v24 }
 0x4df   : > { %827 = vmatmul.mubr.msk.bf16.vlgmr.msra.gmra.mrb[0].mxu1 %vm420_vm8, %v493_v25 }
 0x5b2   : > { %v689_v26 = vpop.f32.mrb[0].mxu1 }
 0x5b3   : > { %v691_v27 = vpop.f32.mrb[1].mxu1  ;;  %v700_v28 = vmul.f32 %v689_v26, %v689_v26 }
 0x5b4   : > { %v693_v29 = vpop.f32.mrb[2].mxu1  ;;  %v696_v31 = vadd.f32 %v691_v27, %v689_v26  ;;  %v701_v32 = vmul.f32 %v691_v27, %v691_v27 }
 0x5b5   : > { %v694_v33 = vpop.f32.mrb[3].mxu1 }
 0x5b6   : > { %697 = vadd.xlane.f32.xlu0 %v696_v31  ;;  %v702_v36 = vadd.f32 %v701_v32, %v700_v28 }
 0x5b8   : > { %703 = vadd.xlane.f32.xlu1 %v702_v36 }
 0x643   : > { %v698_v37 = vpop.xlane.xlu0 %697 }
 0x644   : > { %v699_v38 = vmul.f32 0.00390625, %v698_v37 }
 0x645   : > { %v704_v30 = vpop.xlane.xlu1 %703 }
 0x646   : > { %v705_v39 = vmul.f32 0.00390625, %v704_v30  ;;  %v706_v40 = vmul.f32 %v699_v38, %v699_v38  ;;  %v708_v43 = vsub.f32 %v689_v26, %v699_v38  ;;  %v709_v44 = vsub.f32 %v691_v27, %v699_v38 }
 0x648   : > { %v707_v41 = vsub.f32 %v705_v39, %v706_v40 }
 0x64a   : > { %v710_v42 = vadd.f32 1e-05, %v707_v41 }
 0x64c   : > { %903 = vrsqrt.f32 %v710_v42 }
 0x656   : > { %v904_v35 = vpop.eup %903 }
 0x657   : > { %v712_v45 = vmul.f32 %v904_v35, %v708_v43  ;;  %v713_v34 = vmul.f32 %v904_v35, %v709_v44 }
 0x659   : > { %v714_v46 = vadd.f32 %v712_v45, %v1224_v1  ;;  %v715_v47 = vadd.f32 %v713_v34, %v1222_v0 }
 0x65b   : > { %716 = vst [vmem:[%s199_s24] sm:$0xff] %v714_v46  ;;  %717 = vst [vmem:[%s199_s24 + $0x8] sm:$0xff] %v715_v47 }
 0x65c   : > { %976 = shalt.err (!%p973_p10)
}
 0x65d   : > { %s977_s29 = scalar_lea.hbm %s1437_s6, 256  ;;  %s981_s4 = scalar_lea.hbm %s1484_s3, 512 }
 0x65e   : > { %p978_p1 = scmp.ne.s32.totalorder %s1437_s6, %s977_s29  ;;  %p982_p3 = scmp.lt.u32.totalorder %s1437_s6, %s1484_s3 }
 0x65f   : > { %p983_p11 = scmp.lt.u32.totalorder %s981_s4, %s977_s29  ;;  %p985_p6 = scmp.lt.u32.totalorder %s977_s29, %s1437_s6 }
 0x660   : > { %p979_p2 = pnand %p978_p1, %p1159_p8 }
 0x661   : > { %p984_p4 = por %p983_p11, %p982_p3 }
 0x662   : > { %p980_p7 = pneg %p979_p2 }
 0x663   : > { %p986_p9 = por %p985_p6, %p984_p4 }
 0x665   : > { %p987_p12 = pnand %p986_p9, %p980_p7 }
 0x667   : > { %990 = shalt.err (!%p987_p12)
}
 0x668   : > { %841 = dma.vmem_to_hbm [thread:$0]  (%p1159_p8), %s1439_s25, 256, %s1437_s6, %s719_s16  }
 0x669 PF: > { %s745_s9 = sand.u32 1, %s1021_s12   ;;  %p1513_p13 = scmp.ne.s32.totalorder %s1489_s19, 0 }
 0x66a   : > { %p1514_p0 = scmp.ge.s32.totalorder %s1033_s15, 2  ;;  %s746_s10 = scalar_lea.sflag [#allocation4], %s745_s9 }
 0x66c   : > { %p852_p5 = pnand %p1514_p0, %p1513_p13 }
 0x66e   : > { %1016 = dma.done.wait (!%p852_p5), %s746_s10, 256  }
 0x66f   : > { %1018 = vsyncadd (!%p852_p5), %s746_s10, 4294967040  ;;  %p17_p10 = scmp.ge.s32.totalorder %s1115_s23, 4   ;;  %s1515_s12 = smov %s1025_s13 }
 0x670   : > { %s1516_s13 = smov %s1029_s14  ;;  %s1517_s14 = smov %s1151_s11 }
 0x671   : > { %s1518_s15 = smov %s1115_s23  ;;  %19 = sbr.rel (!%p17_p10) target bundleno = 6 (0x6), region = 81 }
 0x678   :  { %751 = vsyncpa [#allocation3], 1 }
 0x679   :  { %753 = vsyncpa [#allocation3 + $0x1], 1 }
 0x67a   :  { %754 = vsyncpa [#allocation6], 1 }
 0x67b   :  { %755 = vsyncpa [#allocation4], 1 }
 0x67c   :  { %757 = vsyncpa [#allocation4 + $0x1], 1 }

</bundles_post_ra>
